<compile_context>
chip_gen: v7x
topology: tpu7x:2x2x1
jax: 0.10.0
libtpu: 0.0.40
codegen_flags: <defaults>
</compile_context>

<pallas_src>
import jax
import jax.numpy as jnp
from jax.experimental import pallas as pl
from jax.experimental.pallas import tpu as pltpu


# ------------------------------ zero-copy path ------------------------------

def _identity_alias_kernel(x_hbm_ref, o_hbm_ref):
    # Output is aliased to the input buffer (input_output_aliases={0: 0});
    # it already holds the input bytes, so there is nothing to do.
    del x_hbm_ref, o_hbm_ref


# ---------------------------- materializing path ----------------------------

def _make_copy_kernel(num_slices, rows_per_slice):
    """HBM->HBM copy kernel with `num_slices` outstanding DMAs."""

    def kernel(x_hbm_ref, o_hbm_ref, copy_sems):
        if num_slices == 1:
            cp = pltpu.make_async_copy(x_hbm_ref, o_hbm_ref, copy_sems.at[0])
            cp.start()
            cp.wait()
        else:
            copies = []
            for i in range(num_slices):  # static Python loop (trace-time)
                sl = pl.ds(i * rows_per_slice, rows_per_slice)
                cp = pltpu.make_async_copy(
                    x_hbm_ref.at[sl], o_hbm_ref.at[sl], copy_sems.at[i])
                cp.start()
                copies.append(cp)
            for cp in copies:            # wait only after all are in flight
                cp.wait()

    return kernel


def _num_dma_slices(x):
    """Split large arrays into a few DMAs to better fill HBM bandwidth (v7x)."""
    nbytes = x.size * x.dtype.itemsize
    if x.ndim == 0 or nbytes < (64 << 20) or x.shape[0] < 2:
        return 1
    for n in (4, 3, 2):
        if x.shape[0] % n == 0:
            return n
    return 1


# --------------------------------- wrapper ----------------------------------

def identity_pallas(x, materialize=False):
    """Identity forward pass (output == input) as a Pallas TPU kernel.

    Default path aliases the output to the input buffer (no HBM traffic);
    pass materialize=True if a fresh output buffer is semantically required.
    For a true zero-cost identity inside a larger program, jit with
    donate_argnums so the aliased buffer is donated (and do not reuse the
    donated input afterward).
    """
    if x.ndim == 0:
        # Degenerate 0-d scalar: nothing to alias or DMA.
        return x

    if not materialize:
        return pl.pallas_call(
            _identity_alias_kernel,
            out_shape=jax.ShapeDtypeStruct(x.shape, x.dtype),
            in_specs=[pl.BlockSpec(memory_space=pl.ANY)],
            out_specs=pl.BlockSpec(memory_space=pl.ANY),
            input_output_aliases={0: 0},
        )(x)

    num_slices = _num_dma_slices(x)
    rows_per_slice = x.shape[0] // num_slices
    nbytes = x.size * x.dtype.itemsize
    return pl.pallas_call(
        _make_copy_kernel(num_slices, rows_per_slice),
        out_shape=jax.ShapeDtypeStruct(x.shape, x.dtype),
        in_specs=[pl.BlockSpec(memory_space=pl.ANY)],
        out_specs=pl.BlockSpec(memory_space=pl.ANY),
        scratch_shapes=[pltpu.SemaphoreType.DMA((num_slices,))],
        cost_estimate=pl.CostEstimate(
            flops=0, transcendentals=0, bytes_accessed=2 * nbytes),
    )(x)


if __name__ == "__main__":
    key = jax.random.PRNGKey(0)
    # Small NCHW-style input: batch=2, C=4, H=W=16
    x = jax.random.normal(key, (2, 4, 16, 16), dtype=jnp.float32)

    # 1) Zero-copy aliased path (default).
    y = identity_pallas(x)
    jax.block_until_ready(y)
    assert y.shape == x.shape and y.dtype == x.dtype
    assert bool(jnp.all(y == x))

    # 2) Materializing path (fresh buffer via HBM->HBM async DMA).
    y_copy = identity_pallas(x, materialize=True)
    jax.block_until_ready(y_copy)
    assert bool(jnp.all(y_copy == x))

    # 3) Zero-copy path composed under jit with buffer donation: the output
    #    aliases the donated input buffer, so no HBM bytes move at all.
    donated_identity = jax.jit(identity_pallas, donate_argnums=0)
    x_donate = jnp.array(x)            # private copy whose buffer we donate
    y_jit = donated_identity(x_donate)
    jax.block_until_ready(y_jit)
    # x_donate must not be reused after donation; compare against original x.
    assert bool(jnp.all(y_jit == x))

    print("KERNEL_OK")
</pallas_src>

<mosaic_0001>
module attributes {stable_mosaic.version = 11 : i64} {
  func.func @_identity_alias_kernel(%arg0: memref<2x4x16x16xf32, #tpu.memory_space<any>>, %arg1: memref<2x4x16x16xf32, #tpu.memory_space<any>>) attributes {dimension_semantics = [], scalar_prefetch = 0 : i64, scratch_operands = 0 : i64, tpu.core_type = #tpu.core_type<tc>} {
    return
  }
}

</mosaic_0001>

<bundles_post_ra>
// kernel: tpu_custom_call.1
= control target key start
LH: loop header
LB: loop body
LE: loop exit
PB: predicated region body
PF: predicated region fallthrough
CT: control target
= control target key end

     0   :  { %s16_s0 = inlined_call_operand.hbm [shape: f32[2,4,16,16], index: 0, kind: input, shape index: {}, may-alias: {0,1}]   ;;  %s17_s1 = inlined_call_operand.hbm [shape: f32[2,4,16,16], index: 1, kind: output, shape index: {}, may-alias: {0,1}]  }

</bundles_post_ra>
